<compile_context>
chip_gen: v7x
topology: tpu7x:2x2x1
jax: 0.10.0
libtpu: 0.0.40
codegen_flags: <defaults>
</compile_context>

<pallas_src>
import jax
import jax.numpy as jnp
from jax.experimental import pallas as pl
from jax.experimental.pallas import tpu as pltpu

LANES = 128
MAX_TILE_ROWS = 8192          # 8192 * 128 * 4B = 4 MiB f32 per block
MIN_SPLIT_ROWS = 2048         # > 1 MiB -> use >= 2 grid steps (v7x megacore)
VMEM_LIMIT_BYTES = 32 << 20   # 16 MiB live (in+out, double-buffered) + headroom


def conv1x1_kernel(w_ref, b_ref, x_ref, o_ref):
    # w_ref / b_ref are (1,) SMEM scalars; x_ref / o_ref are lane-dense 2D tiles.
    w = w_ref[0]
    b = b_ref[0]
    # Note: .astype truncates for integer output dtypes; inputs here are float.
    o_ref[...] = (x_ref[...].astype(jnp.float32) * w + b).astype(o_ref.dtype)


def _sublane_pack(dtype):
    # Sublane pack factor: 8 for 4-byte, 16 for 2-byte, 32 for 1-byte dtypes.
    return 32 // jnp.dtype(dtype).itemsize


def conv1x1(x, weight, bias):
    """1x1 Conv2d, in_channels=1, out_channels=1, stride=1, padding=0.

    x:      (N, 1, H, W)
    weight: (1, 1, 1, 1)  (PyTorch conv weight shape)
    bias:   (1,)
    """
    N, C, H, W = x.shape
    assert C == 1
    total = N * C * H * W

    w_scalar = weight.reshape(1).astype(jnp.float32)
    b_scalar = bias.reshape(1).astype(jnp.float32)

    # Layout fallback: a non-128-divisible element count would need an HBM
    # pad + output slice (2-3x traffic on a mem-bound op); let XLA fuse the
    # scalar axpy instead.
    if total % LANES != 0:
        return (x.astype(jnp.float32) * w_scalar[0] + b_scalar[0]).astype(x.dtype)

    rows = total // LANES
    slab = x.reshape(rows, LANES)  # free reshape, no copy

    if rows <= MIN_SPLIT_ROWS:
        # Single grid step; block == full array dims, so no sublane rounding
        # (and no padding) is required even when rows % 8 != 0.
        tile_rows = rows
    else:
        # At least 2 grid steps so both v7x TensorCores participate.  Block
        # rows must be a multiple of the sublane pack factor because the
        # block no longer spans the full array; Pallas masks the partial
        # trailing block, so the array itself need not divide evenly.
        sub = _sublane_pack(x.dtype)
        half = ((pl.cdiv(rows, 2) + sub - 1) // sub) * sub
        tile_rows = min(MAX_TILE_ROWS, half)
    grid = (pl.cdiv(rows, tile_rows),)

    out_slab = pl.pallas_call(
        conv1x1_kernel,
        out_shape=jax.ShapeDtypeStruct((rows, LANES), x.dtype),
        grid_spec=pltpu.PrefetchScalarGridSpec(
            num_scalar_prefetch=0,
            grid=grid,
            in_specs=[
                pl.BlockSpec(memory_space=pltpu.SMEM),            # weight scalar
                pl.BlockSpec(memory_space=pltpu.SMEM),            # bias scalar
                pl.BlockSpec((tile_rows, LANES), lambda i: (i, 0)),
            ],
            out_specs=pl.BlockSpec((tile_rows, LANES), lambda i: (i, 0)),
        ),
        compiler_params=pltpu.CompilerParams(
            dimension_semantics=("parallel",),
            vmem_limit_bytes=VMEM_LIMIT_BYTES,
        ),
    )(w_scalar, b_scalar, slab)

    return out_slab.reshape(N, C, H, W)


if __name__ == "__main__":
    key = jax.random.PRNGKey(0)
    kx1, kx2, kx3, kw, kb = jax.random.split(key, 5)

    # Deterministic parameters (Conv2d(1,1,1) -> weight (1,1,1,1), bias (1,)).
    weight = jax.random.normal(kw, (1, 1, 1, 1), dtype=jnp.float32) * 0.5
    bias = jax.random.normal(kb, (1,), dtype=jnp.float32) * 0.1

    def ref(x):
        return x * weight.reshape(()) + bias.reshape(())

    # 1) Small shape from the module spec: single-grid-step full-array block.
    x1 = jax.random.normal(kx1, (2, 1, 16, 16), dtype=jnp.float32)
    o1 = jax.block_until_ready(conv1x1(x1, weight, bias))
    assert o1.shape == x1.shape
    assert jnp.allclose(o1, ref(x1), atol=1e-6, rtol=1e-6)

    # 2) Medium shape: exercises the tiled path (rows=2056 -> 2 grid steps,
    #    blocks of 1032 rows, second one partial and masked by Pallas).
    x2 = jax.random.normal(kx2, (1, 1, 2056, 128), dtype=jnp.float32)
    o2 = jax.block_until_ready(conv1x1(x2, weight, bias))
    assert jnp.allclose(o2, ref(x2), atol=1e-6, rtol=1e-6)

    # 3) Non-128-divisible element count: exercises the fused-XLA fallback.
    x3 = jax.random.normal(kx3, (2, 1, 7, 9), dtype=jnp.float32)
    o3 = jax.block_until_ready(conv1x1(x3, weight, bias))
    assert jnp.allclose(o3, ref(x3), atol=1e-6, rtol=1e-6)

    print("KERNEL_OK")
</pallas_src>

<mosaic_0001>
module attributes {stable_mosaic.version = 11 : i64} {
  func.func @conv1x1_kernel(%arg0: i32, %arg1: memref<1xf32, #tpu.memory_space<smem>>, %arg2: memref<1xf32, #tpu.memory_space<smem>>, %arg3: memref<4x128xf32, #tpu.memory_space<vmem>>, %arg4: memref<4x128xf32, #tpu.memory_space<vmem>>) attributes {dimension_semantics = [#tpu.dimension_semantics<parallel>], iteration_bounds = array<i64: 1>, scalar_prefetch = 0 : i64, scratch_operands = 0 : i64, tpu.core_type = #tpu.core_type<tc>, window_params = [{transform_indices = @transform_0, window_bounds = array<i64: 1>}, {transform_indices = @transform_1, window_bounds = array<i64: 1>}, {transform_indices = @transform_2, window_bounds = array<i64: 4, 128>}, {transform_indices = @transform_3, window_bounds = array<i64: 4, 128>}]} {
    %c0 = arith.constant 0 : index
    %0 = memref.load %arg1[%c0] : memref<1xf32, #tpu.memory_space<smem>>
    %c0_0 = arith.constant 0 : index
    %1 = memref.load %arg2[%c0_0] : memref<1xf32, #tpu.memory_space<smem>>
    %c0_1 = arith.constant 0 : index
    %c0_2 = arith.constant 0 : index
    %2 = vector.load %arg3[%c0_1, %c0_2] : memref<4x128xf32, #tpu.memory_space<vmem>>, vector<4x128xf32>
    %3 = vector.broadcast %0 : f32 to vector<4x128xf32>
    %4 = arith.mulf %2, %3 : vector<4x128xf32>
    %5 = vector.broadcast %1 : f32 to vector<4x128xf32>
    %6 = arith.addf %4, %5 : vector<4x128xf32>
    %c0_3 = arith.constant 0 : index
    %c0_4 = arith.constant 0 : index
    %7 = vector.load %arg4[%c0_3, %c0_4] : memref<4x128xf32, #tpu.memory_space<vmem>>, vector<4x128xf32>
    tpu.vector_store %arg4[%c0_3, %c0_4], %6 {strides = array<i32>} : memref<4x128xf32, #tpu.memory_space<vmem>>, vector<4x128xf32>,
    return
  }
  func.func @transform_0(%arg0: i32) -> i32 {
    %c0_i32 = arith.constant 0 : i32
    %c0_i32_0 = arith.constant 0 : i32
    return %c0_i32 : i32
  }
  func.func @transform_1(%arg0: i32) -> i32 {
    %c0_i32 = arith.constant 0 : i32
    %c0_i32_0 = arith.constant 0 : i32
    return %c0_i32 : i32
  }
  func.func @transform_2(%arg0: i32) -> (i32, i32) {
    %c0_i32 = arith.constant 0 : i32
    %c0_i32_0 = arith.constant 0 : i32
    return %arg0, %c0_i32 : i32, i32
  }
  func.func @transform_3(%arg0: i32) -> (i32, i32) {
    %c0_i32 = arith.constant 0 : i32
    %c0_i32_0 = arith.constant 0 : i32
    return %arg0, %c0_i32 : i32, i32
  }
}

</mosaic_0001>

<bundles_post_ra>
// kernel: tpu_custom_call.1
= control target key start
LH: loop header
LB: loop body
LE: loop exit
PB: predicated region body
PF: predicated region fallthrough
CT: control target
= control target key end

     0   :  { %s106_s0 = inlined_call_operand.<no memory space> [shape: f32[1], index: 0, kind: input, shape index: {}]   ;;  %s107_s1 = inlined_call_operand.<no memory space> [shape: f32[1], index: 1, kind: input, shape index: {}]   ;;  %s108_s2 = inlined_call_operand.vmem [shape: f32[4,128], index: 2, kind: input, shape index: {}]   ;;  %s109_s3 = inlined_call_operand.hbm [shape: f32[4,128], index: 3, kind: output, shape index: {}]  }
   0x1   :  { %v19_v0 = vld [vmem:[%s108_s2] sm:$0xf]  ;;  %v20_v1 = vstv %s106_s0  ;;  %v22_v2 = vstv %s107_s1 }
   0x2   :  { %10 = vsyncpa [#allocation5], 0  ;;  %v21_v3 = vmul.f32 %v20_v1, %v19_v0  ;;  %s64_s18 = smov [#allocation4]  }
   0x3   :  { %s31_s19 = sshll.u32 %s64_s18, 4  ;;  %s32_s19 = int_to_ptr.vmem [resolvable:$true] %s31_s19 }
   0x4   :  { %v23_v4 = vadd.f32 %v22_v2, %v21_v3  ;;  %s40_s20 = scalar_lea.vmem %s32_s19, 64  ;;  %p45_p1 = scmp.lt.s32.totalorder %s32_s19, %s32_s19 }
   0x5   :  { %p41_p0 = scmp.ne.s32.totalorder %s32_s19, %s40_s20  ;;  %p46_p2 = scmp.lt.s32.totalorder %s40_s20, %s40_s20 }
   0x6   :  { %24 = vst [vmem:[#allocation4] sm:$0xf] %v23_v4 }
   0x7   :  { %p47_p3 = por %p46_p2, %p45_p1 }
   0x9   :  { %p48_p4 = pnand %p47_p3, %p41_p0 }
   0xb   :  { %51 = shalt.err (!%p48_p4)
}
   0xc   :  { %s52_s21 = scalar_lea.hbm %s109_s3, 64 }
   0xd   :  { %p53_p5 = scmp.ne.s32.totalorder %s109_s3, %s52_s21  ;;  %p56_p6 = scmp.lt.u32.totalorder %s52_s21, %s109_s3 }
   0xf   :  { %p58_p7 = pnand %p56_p6, %p53_p5 }
  0x11   :  { %61 = shalt.err (!%p58_p7)
}
  0x12   :  { %34 = dma.vmem_to_hbm [thread:$0]  %s32_s19, 64, %s109_s3, [#allocation5]  }
  0x13   :  { %62 = dma.done.wait [#allocation5], 64  }
  0x14   :  { %63 = vsyncadd [#allocation5], 4294967232 }
  0x15   :  { %38 = vsyncpa [#allocation5], 1 }

</bundles_post_ra>
